<compile_context>
chip_gen: v7x
topology: tpu7x:2x2x1
jax: 0.10.0
libtpu: 0.0.40
codegen_flags: <defaults>
</compile_context>

<pallas_src>
import jax
import jax.numpy as jnp
from jax import lax
from jax.experimental import pallas as pl
from jax.experimental.pallas import tpu as pltpu


def cond_emb_kernel(t_ref, tw1_ref, b1_ref, w2_ref, b2_ref, o_ref):
    tb = o_ref.shape[0]
    r_pad = tw1_ref.shape[0]

    # Slice this tile's labels out of the resident label vector.
    start = pl.multiple_of(pl.program_id(0) * tb, 8)
    t = t_ref[pl.ds(start, tb), :]                                # (TB, 1) int32

    # ---- embedding gather fused with Linear1 via one-hot MXU matmul ----
    iota = lax.broadcasted_iota(jnp.int32, (tb, r_pad), 1)        # (TB, R)
    onehot = (t == iota).astype(tw1_ref.dtype)                    # exact in bf16
    h = jnp.dot(onehot, tw1_ref[...],
                preferred_element_type=jnp.float32) + b1_ref[...]  # (TB, dim) f32

    # ---- Swish (f32, EUP) ----
    h = h * jax.nn.sigmoid(h)

    # ---- Linear(dim, dim) ----
    out = jnp.dot(h.astype(w2_ref.dtype), w2_ref[...],
                  preferred_element_type=jnp.float32) + b2_ref[...]  # (TB, dim) f32
    o_ref[...] = out.astype(o_ref.dtype)


def conditional_embedding_pallas(t, params, *, tb=256, compute_dtype=jnp.bfloat16):
    """t: (B,) int labels in [0, num_labels]. params: PyTorch-convention weights."""
    table = params["emb"]                 # (num_labels + 1, d_model), row 0 is padding row
    w1, b1 = params["w1"], params["b1"]   # (dim, d_model), (dim,)
    w2, b2 = params["w2"], params["b2"]   # (dim, dim),     (dim,)

    B = t.shape[0]
    R, d_model = table.shape
    dim = w1.shape[0]

    # Fold the embedding table into the first Linear (exact: both are linear).
    tw1 = table @ w1.T                    # (R, dim) f32

    # Pad folded-table rows to a sublane-friendly multiple (zero rows, never selected).
    r_pad = max(16, -(-R // 16) * 16)
    if r_pad != R:
        tw1 = jnp.pad(tw1, ((0, r_pad - R), (0, 0)))

    # Batch row tile: multiple of 8, capped at the padded batch size.
    tb = max(8, min(int(tb), -(-B // 8) * 8))
    tb = -(-tb // 8) * 8
    b_pad = -(-B // tb) * tb

    # Pad batch with label 0 (padding row -> zero embedding); sliced off below.
    t_pad = jnp.pad(t.astype(jnp.int32), (0, b_pad - B)).reshape(b_pad, 1)

    # Matmul operands in compute_dtype (bf16 fast path on v6e/v7x); biases stay f32.
    tw1_c = tw1.astype(compute_dtype)
    w2t_c = w2.T.astype(compute_dtype)
    b1_r = b1.reshape(1, dim).astype(jnp.float32)
    b2_r = b2.reshape(1, dim).astype(jnp.float32)

    resident = lambda shape: pl.BlockSpec(shape, lambda i: (0, 0))

    out = pl.pallas_call(
        cond_emb_kernel,
        out_shape=jax.ShapeDtypeStruct((b_pad, dim), jnp.float32),
        grid_spec=pltpu.PrefetchScalarGridSpec(
            num_scalar_prefetch=0,
            grid=(b_pad // tb,),
            in_specs=[
                resident((b_pad, 1)),       # labels: resident, sliced in-kernel
                resident((r_pad, dim)),     # folded table @ w1^T
                resident((1, dim)),         # b1
                resident((dim, dim)),       # w2^T
                resident((1, dim)),         # b2
            ],
            out_specs=pl.BlockSpec((tb, dim), lambda i: (i, 0)),
        ),
        compiler_params=pltpu.CompilerParams(
            dimension_semantics=("parallel",),
        ),
    )(t_pad, tw1_c, b1_r, w2t_c, b2_r)

    return out[:B]


def conditional_embedding_reference(t, params):
    """Pure-JAX reference mirroring the PyTorch forward exactly (f32)."""
    emb = params["emb"][t]                                    # (B, d_model)
    h = emb @ params["w1"].T + params["b1"]                   # Linear(d_model, dim)
    h = h * jax.nn.sigmoid(h)                                 # Swish
    return h @ params["w2"].T + params["b2"]                  # Linear(dim, dim)


def make_params(key, num_labels, d_model, dim):
    ks = jax.random.split(key, 5)
    table = 0.1 * jax.random.normal(ks[0], (num_labels + 1, d_model), jnp.float32)
    table = table.at[0].set(0.0)          # padding_idx=0 -> zero row (PyTorch init)
    return {
        "emb": table,
        "w1": 0.1 * jax.random.normal(ks[1], (dim, d_model), jnp.float32),
        "b1": 0.1 * jax.random.normal(ks[2], (dim,), jnp.float32),
        "w2": 0.1 * jax.random.normal(ks[3], (dim, dim), jnp.float32),
        "b2": 0.1 * jax.random.normal(ks[4], (dim,), jnp.float32),
    }


if __name__ == "__main__":
    key = jax.random.PRNGKey(0)
    kt, kp = jax.random.split(key)

    # d_model % 2 == 0 as the module asserts; B=64 / tb=32 gives a 2-step
    # "parallel" grid so both v7x TensorCores get work.
    num_labels, d_model, dim, B = 10, 128, 128, 64
    t = jax.random.randint(kt, (B,), 0, num_labels + 1, dtype=jnp.int32)
    params = make_params(kp, num_labels, d_model, dim)

    ref = conditional_embedding_reference(t, params)

    # Exact-precision path (f32 operands): tight check against the reference.
    out_f32 = jax.block_until_ready(
        conditional_embedding_pallas(t, params, tb=32, compute_dtype=jnp.float32))
    assert out_f32.shape == ref.shape == (B, dim)
    assert jnp.allclose(out_f32, ref, atol=1e-4, rtol=1e-4), \
        float(jnp.max(jnp.abs(out_f32 - ref)))

    # Fast path (bf16 matmul operands, f32 accumulation): loose check.
    out_bf16 = jax.block_until_ready(
        conditional_embedding_pallas(t, params, tb=32, compute_dtype=jnp.bfloat16))
    assert out_bf16.shape == (B, dim)
    assert jnp.allclose(out_bf16, ref, atol=2e-2, rtol=2e-2), \
        float(jnp.max(jnp.abs(out_bf16 - ref)))

    print("KERNEL_OK")
</pallas_src>

<mosaic_0001>
module attributes {stable_mosaic.version = 11 : i64} {
  func.func @cond_emb_kernel(%arg0: i32, %arg1: memref<64x1xi32, #tpu.memory_space<vmem>>, %arg2: memref<16x128xf32, #tpu.memory_space<vmem>>, %arg3: memref<1x128xf32, #tpu.memory_space<vmem>>, %arg4: memref<128x128xf32, #tpu.memory_space<vmem>>, %arg5: memref<1x128xf32, #tpu.memory_space<vmem>>, %arg6: memref<32x128xf32, #tpu.memory_space<vmem>>) attributes {dimension_semantics = [#tpu.dimension_semantics<parallel>], iteration_bounds = array<i64: 2>, scalar_prefetch = 0 : i64, scratch_operands = 0 : i64, tpu.core_type = #tpu.core_type<tc>, window_params = [{pipeline_mode = #tpu.pipeline_mode<synchronous>, transform_indices = @transform_0, window_bounds = array<i64: 64, 1>}, {pipeline_mode = #tpu.pipeline_mode<synchronous>, transform_indices = @transform_1, window_bounds = array<i64: 16, 128>}, {pipeline_mode = #tpu.pipeline_mode<synchronous>, transform_indices = @transform_2, window_bounds = array<i64: 1, 128>}, {pipeline_mode = #tpu.pipeline_mode<synchronous>, transform_indices = @transform_3, window_bounds = array<i64: 128, 128>}, {pipeline_mode = #tpu.pipeline_mode<synchronous>, transform_indices = @transform_4, window_bounds = array<i64: 1, 128>}, {transform_indices = @transform_5, window_bounds = array<i64: 32, 128>}]} {
    %c32_i32 = arith.constant 32 : i32
    %0 = arith.muli %arg0, %c32_i32 : i32
    %1 = tpu.assume_multiple %0, 8 : i32
    %2 = arith.index_cast %1 : i32 to index
    %c0 = arith.constant 0 : index
    %3 = vector.load %arg1[%2, %c0] : memref<64x1xi32, #tpu.memory_space<vmem>>, vector<32x1xi32>
    %4 = tpu.iota {dimensions = array<i32: 1>} : vector<32x16xi32>
    %5 = vector.broadcast %3 : vector<32x1xi32> to vector<32x16xi32>
    %6 = arith.cmpi eq, %5, %4 : vector<32x16xi32>
    %7 = arith.extui %6 : vector<32x16xi1> to vector<32x16xi32>
    %8 = arith.sitofp %7 : vector<32x16xi32> to vector<32x16xf32>
    %c0_0 = arith.constant 0 : index
    %c0_1 = arith.constant 0 : index
    %9 = vector.load %arg2[%c0_0, %c0_1] : memref<16x128xf32, #tpu.memory_space<vmem>>, vector<16x128xf32>
    %cst = arith.constant dense<0.000000e+00> : vector<32x128xf32>
    %10 = tpu.matmul %8, %9, %cst {dimension_numbers = #tpu.dot_dimension_numbers<[1], [0], [0], [1], [0, 0, 1, 1], [], []>} : vector<32x16xf32>, vector<16x128xf32>, vector<32x128xf32> -> vector<32x128xf32>
    %c0_2 = arith.constant 0 : index
    %c0_3 = arith.constant 0 : index
    %11 = vector.load %arg3[%c0_2, %c0_3] : memref<1x128xf32, #tpu.memory_space<vmem>>, vector<1x128xf32>
    %12 = vector.broadcast %11 : vector<1x128xf32> to vector<32x128xf32>
    %13 = arith.addf %10, %12 : vector<32x128xf32>
    %14 = arith.negf %13 : vector<32x128xf32>
    %15 = math.exp %14 : vector<32x128xf32>
    %cst_4 = arith.constant 1.000000e+00 : f32
    %16 = vector.broadcast %cst_4 : f32 to vector<32x128xf32>
    %17 = arith.addf %16, %15 : vector<32x128xf32>
    %18 = arith.divf %16, %17 : vector<32x128xf32>
    %19 = arith.mulf %13, %18 : vector<32x128xf32>
    %c0_5 = arith.constant 0 : index
    %c0_6 = arith.constant 0 : index
    %20 = vector.load %arg4[%c0_5, %c0_6] : memref<128x128xf32, #tpu.memory_space<vmem>>, vector<128x128xf32>
    %cst_7 = arith.constant dense<0.000000e+00> : vector<32x128xf32>
    %21 = tpu.matmul %19, %20, %cst_7 {dimension_numbers = #tpu.dot_dimension_numbers<[1], [0], [0], [1], [0, 0, 1, 1], [], []>} : vector<32x128xf32>, vector<128x128xf32>, vector<32x128xf32> -> vector<32x128xf32>
    %c0_8 = arith.constant 0 : index
    %c0_9 = arith.constant 0 : index
    %22 = vector.load %arg5[%c0_8, %c0_9] : memref<1x128xf32, #tpu.memory_space<vmem>>, vector<1x128xf32>
    %23 = vector.broadcast %22 : vector<1x128xf32> to vector<32x128xf32>
    %24 = arith.addf %21, %23 : vector<32x128xf32>
    %c0_10 = arith.constant 0 : index
    %c0_11 = arith.constant 0 : index
    %25 = vector.load %arg6[%c0_10, %c0_11] : memref<32x128xf32, #tpu.memory_space<vmem>>, vector<32x128xf32>
    tpu.vector_store %arg6[%c0_10, %c0_11], %24 {strides = array<i32>} : memref<32x128xf32, #tpu.memory_space<vmem>>, vector<32x128xf32>,
    return
  }
  func.func @transform_0(%arg0: i32) -> (i32, i32) {
    %c0_i32 = arith.constant 0 : i32
    %c0_i32_0 = arith.constant 0 : i32
    %c0_i32_1 = arith.constant 0 : i32
    return %c0_i32, %c0_i32_0 : i32, i32
  }
  func.func @transform_1(%arg0: i32) -> (i32, i32) {
    %c0_i32 = arith.constant 0 : i32
    %c0_i32_0 = arith.constant 0 : i32
    %c0_i32_1 = arith.constant 0 : i32
    return %c0_i32, %c0_i32_0 : i32, i32
  }
  func.func @transform_2(%arg0: i32) -> (i32, i32) {
    %c0_i32 = arith.constant 0 : i32
    %c0_i32_0 = arith.constant 0 : i32
    %c0_i32_1 = arith.constant 0 : i32
    return %c0_i32, %c0_i32_0 : i32, i32
  }
  func.func @transform_3(%arg0: i32) -> (i32, i32) {
    %c0_i32 = arith.constant 0 : i32
    %c0_i32_0 = arith.constant 0 : i32
    %c0_i32_1 = arith.constant 0 : i32
    return %c0_i32, %c0_i32_0 : i32, i32
  }
  func.func @transform_4(%arg0: i32) -> (i32, i32) {
    %c0_i32 = arith.constant 0 : i32
    %c0_i32_0 = arith.constant 0 : i32
    %c0_i32_1 = arith.constant 0 : i32
    return %c0_i32, %c0_i32_0 : i32, i32
  }
  func.func @transform_5(%arg0: i32) -> (i32, i32) {
    %c0_i32 = arith.constant 0 : i32
    %c0_i32_0 = arith.constant 0 : i32
    return %arg0, %c0_i32 : i32, i32
  }
}

</mosaic_0001>

<bundles_post_ra>
// kernel: tpu_custom_call.1
= control target key start
LH: loop header
LB: loop body
LE: loop exit
PB: predicated region body
PF: predicated region fallthrough
CT: control target
= control target key end

     0   :  { %10 = vsyncpa [#allocation3], 0  ;;  %s1070_s0 = inlined_call_operand.vmem [shape: s32[64,1], index: 0, kind: input, shape index: {}]   ;;  %s1071_s1 = inlined_call_operand.vmem [shape: f32[16,128], index: 1, kind: input, shape index: {}]   ;;  %s1072_s2 = inlined_call_operand.vmem [shape: f32[1,128], index: 2, kind: input, shape index: {}]   ;;  %s1073_s3 = inlined_call_operand.hbm [shape: f32[128,128], index: 3, kind: input, shape index: {}]   ;;  %s1074_s4 = inlined_call_operand.vmem [shape: f32[1,128], index: 4, kind: input, shape index: {}]   ;;  %s1075_s5 = inlined_call_operand.hbm [shape: f32[64,128], index: 5, kind: output, shape index: {}]  }
   0x1   :  { %11 = vsyncpa [#allocation4], 0 }
   0x2   :  { %13 = vsyncpa [#allocation4 + $0x1], 0  ;;  %s921_s18 = smov 0   ;;  %s923_s19 = smov 0  }
   0x3   :  { %s925_s20 = smov 0   ;;  %s927_s21 = smov 0  }
   0x4 LB: > { %s942_s22 = sadd.s32 4294967295, %s881_s21   ;;  %s576_s23 = sadd.s32 4294967294, %s881_s21   ;;  %s881_s21 = sphi %s927_s21, %s1091_s21   ;;  %s877_s20 = sphi %s925_s20, %s1090_s20   ;;  %s873_s19 = sphi %s923_s19, %s1089_s19   ;;  %s869_s18 = sphi %s921_s18, %s1088_s18  }
   0x5   : > { %s946_s24 = sadd.s32 1, %s881_s21   ;;  %s131_s25 = sadd.s32 1, %s877_s20 }
   0x6   : > { %s128_s26 = ssub.s32 %s881_s21, %s946_s24  ;;  %p141_p0 = scmp.ne.s32.totalorder %s877_s20, %s873_s19 }
   0x7   : > { %p129_p1 = scmp.eq.s32.totalorder %s128_s26, 0  ;;  %p142_p2 = scmp.eq.s32.totalorder %s942_s22, 1 }
   0x8   : > { %p147_p3 = scmp.ne.s32.totalorder %s873_s19, %s869_s18  ;;  %p148_p4 = scmp.eq.s32.totalorder %s576_s23, 1 }
   0x9   : > { %s957_s27 = scalar_select %p129_p1, %s877_s20, %s131_s25  }
   0xa   : > { %p959_p5 = por %p142_p2, %p141_p0  ;;  %p963_p6 = por %p148_p4, %p147_p3 }
   0xb   : > { %p577_p7 = scmp.ge.s32.totalorder %s881_s21, 1  ;;  %p155_p8 = scmp.lt.s32.totalorder %s881_s21, 3 }
   0xc   : > { %s1079_s28 = scalar_select %p959_p5, 1, 0 }
   0xd   : > { %s1080_s29 = scalar_select %p963_p6, 1, 0 }
   0xe   : > { %p1076_p9 = scmp.eq.s32.totalorder %s942_s22, 0  ;;  %p970_p10 = pnand %p577_p7, %p155_p8 }
   0xf   : > { %s883_s6 = smov [#allocation2]   ;;  %s787_s11 = scalar_lea.hbm %s1073_s3, 2048 }
  0x10   : > { %s1081_s30 = scalar_select %p970_p10, 1, 0 }
  0x11   : > { %s176_s7 = sshll.u32 %s883_s6, 4  ;;  %p719_p11 = pneg %p970_p10  ;;  %s177_s7 = int_to_ptr.vmem [resolvable:$true] %s176_s7 }
  0x12   : > { %p788_p13 = scmp.ne.s32.totalorder %s1073_s3, %s787_s11  ;;  %p794_p3 = scmp.lt.u32.totalorder %s787_s11, %s1073_s3 }
  0x13   : > { %p978_p12 = pnand %p1076_p9, %p719_p11 }
  0x15   : > { %p789_p0 = pneg %p978_p12 }
  0x17   : > { %p790_p1 = pnand %p789_p0, %p788_p13 }
  0x19   : > { %p791_p2 = pneg %p790_p1 }
  0x1b   : > { %p796_p4 = pnand %p794_p3, %p791_p2 }
  0x1d   : > { %799 = shalt.err (!%p796_p4)
}
  0x1e   : > { %s800_s16 = scalar_lea.vmem %s177_s7, 2048  ;;  %p808_p9 = scmp.lt.s32.totalorder %s177_s7, %s177_s7 }
  0x1f   : > { %p801_p7 = scmp.ne.s32.totalorder %s177_s7, %s800_s16  ;;  %p809_p6 = scmp.lt.s32.totalorder %s800_s16, %s800_s16 }
  0x21   : > { %p803_p8 = pnand %p801_p7, %p789_p0  ;;  %p810_p5 = por %p809_p6, %p808_p9 }
  0x23   : > { %p804_p11 = pneg %p803_p8 }
  0x25   : > { %p811_p10 = pnand %p810_p5, %p804_p11 }
  0x27   : > { %814 = shalt.err (!%p811_p10)
}
  0x28   : > { %s884_s17 = smov 128   ;;  %s885_s23 = smov 8  }
  0x29   : > { %722 = dma.hbm_to_vmem [thread:$0]  (!%p978_p12), %s1073_s3, 2048, %s177_s7, [#allocation3], %s884_s17, %s884_s17, %s885_s23  }
  0x2a   : > { %p1083_p13 = scmp.ne.s32.totalorder %s1081_s30, 0 }
  0x2b   : > { %p1084_p1 = scmp.eq.s32.totalorder (!%p1083_p13), %s942_s22, 0 }
  0x2c   : > { %195 = sbr.rel (%p1083_p13) target bundleno = 667 (0x29b), region = 40 }
  0x33   : > { %860 = dma.done.wait (%p1084_p1), [#allocation3], 2048   ;;  %p1085_p0 = pmov %p1084_p1 }
  0x34   : > { %v886_v0 = vmov 0   ;;  %s582_s6 = sshll.u32 %s942_s22, 5  ;;  %v251_v3 = vld [vmem:[%s1071_s1] sm:$0xff]  ;;  %v252_v4 = vld [vmem:[%s1071_s1 + $0x8] sm:$0xff]  ;;  %v225_v8 = vlaneseq  ;;  %vm260_vm0 = vcmask 130048   ;;  %v887_v12 = vmov 0.0  }
  0x35   : > { %862 = vsyncadd (%p1085_p0), [#allocation3], 4294965248  ;;  %770 = vset.pattern.permute.xlu1 %v886_v0  ;;  %769 = vset.pattern.permute.xlu0 %v886_v0  ;;  %s220_s10 = scalar_lea.vmem %s1070_s0, %s582_s6  ;;  %v677_v7 = vpack.c.bf16 %v252_v4, %v251_v3  ;;  %v386_v19 = vld [vmem:[#allocation2] sm:$0xff]  ;;  %v387_v20 = vld [vmem:[#allocation2 + $0x8] sm:$0xff]  ;;  %s215_s15 = sand.u32 1, %s873_s19  }
  0x36   : > { %v223_v1 = vld [vmem:[%s220_s10 + $0x10] sm:$0xff]  ;;  %v221_v2 = vld [vmem:[%s220_s10] sm:$0xff]  ;;  %v224_v5 = vld [vmem:[%s220_s10 + $0x18] sm:$0xff]  ;;  %v226_v9 = vand.u32 127, %v225_v8  ;;  %v681_v21 = vpack.c.bf16 %v387_v20, %v386_v19  ;;  %s581_s16 = sshll.u32 %s215_s15, 5  ;;  %s602_s6 = sshll.u32 %s942_s22, 9 }
  0x37   : > { %234 = vperm.xlu1 %770, %v223_v1   ;;  %228 = vperm.xlu0 %769, %v221_v2   ;;  %v222_v6 = vld [vmem:[%s220_s10 + $0x8] sm:$0xff]  ;;  %v388_v22 = vld [vmem:[#allocation2 + $0x10] sm:$0xff]  ;;  %v389_v23 = vld [vmem:[#allocation2 + $0x18] sm:$0xff]  ;;  %s217_s25 = scalar_lea.vmem [#allocation5], %s581_s16  ;;  %s1027_s10 = scalar_lea.hbm %s1075_s5, %s602_s6 }
  0x38   : > { %678 = vmatprep.subr.bf16.mxu0 %v677_v7  ;;  %682 = vmatprep.subr.bf16.mxu1 %v681_v21  ;;  %v685_v24 = vpack.c.bf16 %v389_v23, %v388_v22  ;;  %v390_v25 = vld [vmem:[#allocation2 + $0x20] sm:$0xff]  ;;  %v391_v26 = vld [vmem:[#allocation2 + $0x28] sm:$0xff]  ;;  %v392_v28 = vld [vmem:[#allocation2 + $0x30] sm:$0xff]  ;;  %s512_s26 = sshll.u32 %s217_s25, 4  ;;  %s1029_s30 = scalar_lea.sflag [#allocation4], %s215_s15  ;;  %s1022_s26 = int_to_ptr.vmem [resolvable:$true] %s512_s26 }
  0x39   : > { %680 = vmatpush3.bf16.msra.mxu0 %v677_v7  ;;  %684 = vmatpush3.bf16.msra.mxu1 %v681_v21  ;;  %v689_v27 = vpack.c.bf16 %v391_v26, %v390_v25  ;;  %v393_v29 = vld [vmem:[#allocation2 + $0x38] sm:$0xff]  ;;  %v394_v31 = vld [vmem:[#allocation2 + $0x40] sm:$0xff]  ;;  %v395_v32 = vld [vmem:[#allocation2 + $0x48] sm:$0xff]  ;;  %s815_s22 = scalar_lea.vmem %s1022_s26, 512  ;;  %p1086_p6 = scmp.ne.s32.totalorder %s1079_s28, 0 }
  0x3a   : > { %686 = vmatprep.subr.bf16.mxu1 %v685_v24  ;;  %v693_v30 = vpack.c.bf16 %v393_v29, %v392_v28  ;;  %v697_v33 = vpack.c.bf16 %v395_v32, %v394_v31  ;;  %v396_v34 = vld [vmem:[#allocation2 + $0x50] sm:$0xff]  ;;  %v397_v35 = vld [vmem:[#allocation2 + $0x58] sm:$0xff]  ;;  %v398_v37 = vld [vmem:[#allocation2 + $0x60] sm:$0xff]  ;;  %p816_p5 = scmp.ne.s32.totalorder %s1022_s26, %s815_s22  ;;  %s888_s7 = smov [#allocation5]  }
  0x3b   : > { %237 = vperm.xlu1 %770, %v224_v5   ;;  %231 = vperm.xlu0 %769, %v222_v6   ;;  %v701_v36 = vpack.c.bf16 %v397_v35, %v396_v34  ;;  %v399_v38 = vld [vmem:[#allocation2 + $0x68] sm:$0xff]  ;;  %v400_v40 = vld [vmem:[#allocation2 + $0x70] sm:$0xff]  ;;  %v401_v41 = vld [vmem:[#allocation2 + $0x78] sm:$0xff]  ;;  %s819_s11 = sshll.u32 %s888_s7, 4  ;;  %s820_s11 = int_to_ptr.vmem [resolvable:$false] %s819_s11 }
  0x3c   : > { %v705_v39 = vpack.c.bf16 %v399_v38, %v398_v37  ;;  %v709_v42 = vpack.c.bf16 %v401_v41, %v400_v40  ;;  %v587_v43 = vld [vmem:[%s1072_s2] ss:$0 sm:$0xff]  ;;  %p817_p9 = pnand %p816_p5, %p1086_p6  ;;  %s821_s12 = scalar_lea.vmem %s820_s11, 1024 }
  0x3d   : > { %688 = vmatpush3.bf16.msra.mxu1 %v685_v24  ;;  %v596_v8 = vld [vmem:[%s1074_s4] ss:$0 sm:$0xff]  ;;  %p822_p12 = scmp.lt.s32.totalorder %s1022_s26, %s820_s11  ;;  %p823_p2 = scmp.lt.s32.totalorder %s821_s12, %s815_s22 }
  0x3e   : > { %690 = vmatprep.subr.bf16.mxu1 %v689_v27  ;;  %p818_p10 = pneg %p817_p9 }
  0x3f   : > { %p824_p3 = por %p823_p2, %p822_p12 }
  0x41   : > { %692 = vmatpush3.bf16.msra.mxu1 %v689_v27  ;;  %p825_p4 = pnand %p824_p3, %p818_p10 }
  0x42   : > { %694 = vmatprep.subr.bf16.mxu1 %v693_v30 }
  0x45   : > { %696 = vmatpush3.bf16.msra.mxu1 %v693_v30 }
  0x46   : > { %698 = vmatprep.subr.bf16.mxu1 %v697_v33 }
  0x49   : > { %700 = vmatpush3.bf16.msra.mxu1 %v697_v33 }
  0x4a   : > { %702 = vmatprep.subr.bf16.mxu1 %v701_v36 }
  0x4d   : > { %704 = vmatpush3.bf16.msra.mxu1 %v701_v36 }
  0x4e   : > { %706 = vmatprep.subr.bf16.mxu1 %v705_v39 }
  0x51   : > { %708 = vmatpush3.bf16.msra.mxu1 %v705_v39 }
  0x52   : > { %710 = vmatprep.subr.bf16.mxu1 %v709_v42 }
  0x55   : > { %712 = vmatpush3.bf16.msra.mxu1 %v709_v42 }
  0xb6   : > { %v235_v10 = vpop.permute.xlu1 %234  ;;  %v229_v11 = vpop.permute.xlu0 %228 }
  0xb7   : > { %vm239_vm1 = vcmp.eq.s32.totalorder %v229_v11, %v226_v9  ;;  %vm241_vm2 = vcmp.eq.s32.totalorder %v235_v10, %v226_v9 }
  0xb8   : > { %v583_v13 = vsel %vm239_vm1, 1.0, %v887_v12  ;;  %v585_v16 = vsel %vm241_vm2, 1.0, %v887_v12 }
  0xb9   : > { %633 = vmatprep.mubr.msk.f32.mxu0 %vm260_vm0, %v583_v13 }
  0xba   : > { %v238_v14 = vpop.permute.xlu1 %237  ;;  %v232_v15 = vpop.permute.xlu0 %231 }
  0xbb   : > { %vm240_vm3 = vcmp.eq.s32.totalorder %v232_v15, %v226_v9  ;;  %vm242_vm4 = vcmp.eq.s32.totalorder %v238_v14, %v226_v9 }
  0xbc   : > { %v584_v17 = vsel %vm240_vm3, 1.0, %v887_v12  ;;  %v586_v18 = vsel %vm242_vm4, 1.0, %v887_v12 }
  0xbd   : > { %634 = vmatmul.mubr.msk.f32.vlgmr.msra.gmra.mrb[0].mxu0 %vm260_vm0, %v584_v17 }
  0xbe   : > { %636 = vmatprep.mubr.msk.f32.mxu0 %vm260_vm0, %v585_v16 }
  0xc1   : > { %637 = vmatmul.mubr.msk.f32.gmra.mrb[2].mxu0 %vm260_vm0, %v586_v18 }
 0x190   : > { %v635_v44 = vpop.f32.mrb[0].mxu0 }
 0x191   : > { %v345_v45 = vadd.f32 %v635_v44, %v587_v43  ;;  %v339_v46 = vpop.f32.mrb[1].mxu0 }
 0x192   : > { %v340_v47 = vadd.f32 %v587_v43, %v339_v46 }
 0x193   : > { %v593_v48 = vmul.f32 -1.442695, %v345_v45 }
 0x194   : > { %v592_v49 = vmul.f32 -1.442695, %v340_v47  ;;  %v638_v50 = vpop.f32.mrb[2].mxu0 }
 0x195   : > { %771 = vpow2.f32 %v593_v48  ;;  %v355_v51 = vadd.f32 %v638_v50, %v587_v43  ;;  %v349_v52 = vpop.f32.mrb[3].mxu0 }
 0x196   : > { %773 = vpow2.f32 %v592_v49  ;;  %v350_v53 = vadd.f32 %v587_v43, %v349_v52 }
 0x197   : > { %v595_v54 = vmul.f32 -1.442695, %v355_v51 }
 0x198   : > { %v594_v55 = vmul.f32 -1.442695, %v350_v53 }
 0x199   : > { %775 = vpow2.f32 %v595_v54 }
 0x19a   : > { %777 = vpow2.f32 %v594_v55 }
 0x19f   : > { %v772_v56 = vpop.eup %771 }
 0x1a0   : > { %v774_v57 = vpop.eup %773  ;;  %v371_v58 = vadd.f32 1.0, %v772_v56 }
 0x1a1   : > { %v370_v59 = vadd.f32 1.0, %v774_v57 }
 0x1a2   : > { %779 = vrcp.f32 %v371_v58 }
 0x1a3   : > { %v776_v60 = vpop.eup %775  ;;  %781 = vrcp.f32 %v370_v59 }
 0x1a4   : > { %v778_v61 = vpop.eup %777  ;;  %v373_v62 = vadd.f32 1.0, %v776_v60 }
 0x1a5   : > { %v372_v63 = vadd.f32 1.0, %v778_v61 }
 0x1a6   : > { %783 = vrcp.f32 %v373_v62 }
 0x1a7   : > { %785 = vrcp.f32 %v372_v63 }
 0x1ac   : > { %v780_v0 = vpop.eup %779 }
 0x1ad   : > { %v782_v1 = vpop.eup %781  ;;  %v383_v3 = vmul.f32 %v780_v0, %v345_v45 }
 0x1ae   : > { %v382_v2 = vmul.f32 %v782_v1, %v340_v47 }
 0x1b0   : > { %v784_v4 = vpop.eup %783  ;;  %671 = vmatprep.mubr.f32.mxu1 %v382_v2 }
 0x1b1   : > { %v786_v5 = vpop.eup %785  ;;  %672 = vmatmul.mubr.f32.vlgmr.msra.gmra.mrb[0].mxu1 %v383_v3  ;;  %v385_v7 = vmul.f32 %v784_v4, %v355_v51 }
 0x1b2   : > { %v384_v6 = vmul.f32 %v786_v5, %v350_v53 }
 0x1b4   : > { %674 = vmatprep.mubr.f32.mxu1 %v384_v6 }
 0x1b5   : > { %675 = vmatmul.mubr.f32.gmra.mrb[2].mxu1 %v385_v7 }
 0x284   : > { %v673_v9 = vpop.f32.mrb[0].mxu1 }
 0x285   : > { %v481_v10 = vadd.f32 %v673_v9, %v596_v8  ;;  %v475_v11 = vpop.f32.mrb[1].mxu1 }
 0x286   : > { %v476_v12 = vadd.f32 %v596_v8, %v475_v11 }
 0x287   : > { %495 = vst [vmem:[%s217_s25 + $0x8] sm:$0xff] %v481_v10 }
 0x288   : > { %494 = vst [vmem:[%s217_s25] sm:$0xff] %v476_v12  ;;  %v676_v13 = vpop.f32.mrb[2].mxu1 }
 0x289   : > { %v491_v14 = vadd.f32 %v676_v13, %v596_v8  ;;  %v485_v15 = vpop.f32.mrb[3].mxu1 }
 0x28a   : > { %v486_v16 = vadd.f32 %v596_v8, %v485_v15 }
 0x28b   : > { %497 = vst [vmem:[%s217_s25 + $0x18] sm:$0xff] %v491_v14 }
 0x28c   : > { %496 = vst [vmem:[%s217_s25 + $0x10] sm:$0xff] %v486_v16 }
 0x28d   : > { %828 = shalt.err (!%p825_p4)
}
 0x28e   : > { %s829_s13 = scalar_lea.hbm %s1027_s10, 512  ;;  %s833_s16 = scalar_lea.hbm %s1075_s5, 1024 }
 0x28f   : > { %p830_p7 = scmp.ne.s32.totalorder %s1027_s10, %s829_s13  ;;  %p834_p13 = scmp.lt.u32.totalorder %s1027_s10, %s1075_s5 }
 0x290   : > { %p835_p1 = scmp.lt.u32.totalorder %s833_s16, %s829_s13  ;;  %p837_p5 = scmp.lt.u32.totalorder %s829_s13, %s1027_s10 }
 0x291   : > { %p831_p8 = pnand %p830_p7, %p1086_p6 }
 0x292   : > { %p836_p0 = por %p835_p1, %p834_p13 }
 0x293   : > { %p832_p11 = pneg %p831_p8 }
 0x294   : > { %p838_p9 = por %p837_p5, %p836_p0 }
 0x296   : > { %p839_p10 = pnand %p838_p9, %p832_p11 }
 0x298   : > { %842 = shalt.err (!%p839_p10)
}
 0x299   : > { %s889_s25 = smov 128   ;;  %s890_s6 = smov 8  }
 0x29a   : > { %717 = dma.vmem_to_hbm [thread:$0]  (%p1086_p6), %s1022_s26, 512, %s1027_s10, %s1029_s30, %s889_s25, %s889_s25, %s890_s6  }
 0x29b PF: > { %p729_p12 = scmp.ge.s32.totalorder %s881_s21, 2  ;;  %s527_s9 = sand.u32 1, %s869_s18  }
 0x29c   : > { %p1087_p2 = scmp.ne.s32.totalorder %s1080_s29, 0  ;;  %s528_s8 = scalar_lea.sflag [#allocation4], %s527_s9 }
 0x29e   : > { %p724_p3 = pnand %p729_p12, %p1087_p2 }
 0x2a0   : > { %864 = dma.done.wait (!%p724_p3), %s528_s8, 512  }
 0x2a1   : > { %866 = vsyncadd (!%p724_p3), %s528_s8, 4294966784  ;;  %p16_p4 = scmp.ge.s32.totalorder %s946_s24, 4   ;;  %s1088_s18 = smov %s873_s19 }
 0x2a2   : > { %s1089_s19 = smov %s877_s20  ;;  %s1090_s20 = smov %s957_s27 }
 0x2a3   : > { %s1091_s21 = smov %s946_s24  ;;  %18 = sbr.rel (!%p16_p4) target bundleno = 4 (0x4), region = 78 }
 0x2aa   :  { %533 = vsyncpa [#allocation3], 1 }
 0x2ab   :  { %535 = vsyncpa [#allocation3 + $0x1], 1 }
 0x2ac   :  { %536 = vsyncpa [#allocation4], 1 }
 0x2ad   :  { %538 = vsyncpa [#allocation4 + $0x1], 1 }

</bundles_post_ra>
